<compile_context>
chip_gen: v6e
topology: v6e:2x2x1
jax: 0.10.0
libtpu: 0.0.40
codegen_flags: <defaults>
</compile_context>

<pallas_src>
import jax
import jax.numpy as jnp
import numpy as np
from jax import lax
from jax.experimental import pallas as pl
from jax.experimental.pallas import tpu as pltpu

C = 30  # 2 boxes * 5 + 20 classes


def yolo_loss_kernel(pred_ref, targ_ref, out_ref, acc_ref):
    k = pl.program_id(1)

    @pl.when(k == 0)
    def _init():
        acc_ref[...] = jnp.zeros_like(acc_ref)

    p = pred_ref[...].astype(jnp.float32)   # (30, TL) channel-major: cells on lanes
    t = targ_ref[...].astype(jnp.float32)   # (30, TL)

    t_conf = t[4:5, :]                      # (1, TL)
    coo = t_conf > 0.0                      # object cells
    noo = t_conf == 0.0                     # no-object cells (zero padding lands here too)

    # --- no-object confidence loss: channels 4 and 9 only ---
    d4 = p[4:5, :] - t[4:5, :]
    d9 = p[9:10, :] - t[9:10, :]
    noo_term = jnp.where(noo, d4 * d4 + d9 * d9, 0.0)            # (1, TL)

    # --- class loss: channels 10..29 on object cells ---
    dc = p[10:30, :] - t[10:30, :]                               # (20, TL)
    class_term = jnp.where(coo, dc * dc, 0.0)                    # (20, TL)

    # --- responsible-box choice: buggy IoU of both pred boxes vs FIRST target box ---
    t_lo = t[0:2, :] - 0.5 * t[2:4, :]                           # (2, TL)
    t_hi = t[0:2, :] + 0.5 * t[2:4, :]
    t_wh = t_hi - t_lo
    area_t = t_wh[0:1, :] * t_wh[1:2, :]                         # (1, TL)

    def buggy_iou(b):                                            # b: (4, TL) = [x, y, w, h]
        lo = b[0:2, :] - 0.5 * b[2:4, :]
        hi = b[0:2, :] + 0.5 * b[2:4, :]
        lt = jnp.maximum(lo, t_lo)
        rb = jnp.minimum(hi, t_hi)
        whf = ((rb - lt) < 0.0).astype(jnp.float32)              # reference bug, kept
        inter = whf[0:1, :] * whf[1:2, :]
        pwh = hi - lo
        area_p = pwh[0:1, :] * pwh[1:2, :]
        # exact divide (not approx reciprocal) so the argmax matches the reference
        return inter / (area_p + area_t - inter)

    sel1 = buggy_iou(p[5:9, :]) > buggy_iou(p[0:4, :])           # (1, TL); ties/NaN -> box0

    # --- responsible box as a 5-sublane slab: loc + (contain + duplicated not_contain) ---
    pb = jnp.where(sel1, p[5:10, :], p[0:5, :])                  # (5, TL) [x, y, w, h, c]
    tb = jnp.where(sel1, t[5:10, :], t[0:5, :])
    d_xy = pb[0:2, :] - tb[0:2, :]                               # (2, TL)
    d_wh = jnp.sqrt(pb[2:4, :]) - jnp.sqrt(tb[2:4, :])           # sqrt only on the w/h rows
    d_c = pb[4:5, :] - tb[4:5, :]                                # (1, TL)
    # jnp.where BEFORE any reduction so sqrt / IoU NaNs on no-object rows never leak in
    loc_xy = jnp.where(coo, d_xy * d_xy, 0.0)                    # (2, TL)
    loc_wh = jnp.where(coo, d_wh * d_wh, 0.0)                    # (2, TL)
    contain2 = jnp.where(coo, 2.0 * (d_c * d_c), 0.0)            # (1, TL) contain + dup not_contain

    per_cell = (noo_term
                + jnp.sum(class_term, axis=0, keepdims=True)
                + jnp.sum(loc_xy, axis=0, keepdims=True)
                + jnp.sum(loc_wh, axis=0, keepdims=True)
                + contain2)                                      # (1, TL)
    step_sum = jnp.sum(per_cell, axis=1, keepdims=True)          # (1, 1) scalar for this tile
    acc_ref[...] += step_sum                                     # splat into one (8,128) vreg

    @pl.when(k == pl.num_programs(1) - 1)
    def _finalize():
        out_ref[...] = acc_ref[...]                              # lane-dense (8,128) store


def _round_up(x, m):
    return -(-x // m) * m


def _num_tc_partitions():
    """2 partitions (core-parallel) on v7x's dual TensorCores, else 1."""
    try:
        kind = jax.devices()[0].device_kind.lower()
    except Exception:
        return 1
    return 2 if ("v7" in kind or "7x" in kind) else 1


def yolo_loss(pred, target, *, tile_lanes=8192, nparts=None):
    assert pred.shape == target.shape and pred.shape[-1] == C
    B = pred.shape[0]
    R = int(np.prod(pred.shape[:-1]))
    # channel-major: (30, R) so cells sit on the lane axis inside the kernel
    p2 = jnp.transpose(pred.reshape(R, C))
    t2 = jnp.transpose(target.reshape(R, C))

    if nparts is None:
        nparts = _num_tc_partitions()
    per_part = -(-R // nparts)
    tl = _round_up(max(128, min(int(tile_lanes), _round_up(per_part, 128))), 128)
    steps = -(-per_part // tl)               # grid steps per partition
    R_pad = nparts * steps * tl
    if R_pad != R:                           # zero cells contribute exactly 0 to every term
        p2 = jnp.pad(p2, ((0, 0), (0, R_pad - R)))
        t2 = jnp.pad(t2, ((0, 0), (0, R_pad - R)))

    if nparts > 1:
        dims = (pltpu.CORE_PARALLEL, pltpu.ARBITRARY)   # real 2-TC split on v7x
    else:
        dims = (pltpu.ARBITRARY, pltpu.ARBITRARY)

    out = pl.pallas_call(
        yolo_loss_kernel,
        out_shape=jax.ShapeDtypeStruct((nparts * 8, 128), jnp.float32),
        grid_spec=pltpu.PrefetchScalarGridSpec(
            num_scalar_prefetch=0,
            grid=(nparts, steps),
            in_specs=[pl.BlockSpec((C, tl), lambda i, k: (0, i * steps + k)),
                      pl.BlockSpec((C, tl), lambda i, k: (0, i * steps + k))],
            out_specs=pl.BlockSpec((8, 128), lambda i, k: (i, 0)),
            scratch_shapes=[pltpu.VMEM((8, 128), jnp.float32)],
        ),
        compiler_params=pltpu.CompilerParams(dimension_semantics=dims),
    )(p2, t2)

    partials = out.reshape(nparts, 8, 128)[:, 0, 0]   # one partial per partition
    return jnp.sum(partials) / jnp.float32(B)


def myloss_ref_numpy(pred, target):
    """Pure-NumPy transcription of the PyTorch forward (dynamic masking + loop)."""
    pred = np.asarray(pred, dtype=np.float64)
    target = np.asarray(target, dtype=np.float64)
    N = pred.shape[0]
    coo_mask = target[..., 4] > 0
    noo_mask = target[..., 4] == 0
    coo_pred = pred[coo_mask].reshape(-1, 30)
    box_pred = coo_pred[:, :10].reshape(-1, 5)
    class_pred = coo_pred[:, 10:]
    coo_target = target[coo_mask].reshape(-1, 30)
    box_target = coo_target[:, :10].reshape(-1, 5)
    class_target = coo_target[:, 10:]
    noo_pred = pred[noo_mask].reshape(-1, 30)
    noo_target = target[noo_mask].reshape(-1, 30)
    nooobj_loss = np.sum((noo_pred[:, [4, 9]] - noo_target[:, [4, 9]]) ** 2)

    resp = np.zeros(box_target.shape[0], dtype=bool)
    for i in range(0, box_target.shape[0], 2):
        box1 = box_pred[i:i + 2]
        b1 = np.empty((2, 4))
        b1[:, :2] = box1[:, :2] - 0.5 * box1[:, 2:4]
        b1[:, 2:] = box1[:, :2] + 0.5 * box1[:, 2:4]
        box2 = box_target[i:i + 1]
        b2 = np.empty((1, 4))
        b2[:, :2] = box2[:, :2] - 0.5 * box2[:, 2:4]
        b2[:, 2:] = box2[:, :2] + 0.5 * box2[:, 2:4]
        lt = np.maximum(b1[:, None, :2], b2[None, :, :2])
        rb = np.minimum(b1[:, None, 2:], b2[None, :, 2:])
        wh = ((rb - lt) < 0).astype(np.float64)            # reference bug, kept
        inter = wh[:, :, 0] * wh[:, :, 1]
        area1 = ((b1[:, 2] - b1[:, 0]) * (b1[:, 3] - b1[:, 1]))[:, None]
        area2 = ((b2[:, 2] - b2[:, 0]) * (b2[:, 3] - b2[:, 1]))[None, :]
        iou = inter / (area1 + area2 - inter)
        max_index = int(np.argmax(iou[:, 0]))
        resp[i + max_index] = True

    bpr = box_pred[resp]
    btr = box_target[resp]
    contain_loss = np.sum((bpr[:, 4] - btr[:, 4]) ** 2)
    loc_loss = (np.sum((bpr[:, :2] - btr[:, :2]) ** 2) +
                np.sum((np.sqrt(bpr[:, 2:4]) - np.sqrt(btr[:, 2:4])) ** 2))
    not_contain_loss = contain_loss                         # reference bug, kept
    class_loss = np.sum((class_pred - class_target) ** 2)
    return (loc_loss + contain_loss + not_contain_loss + nooobj_loss + class_loss) / N


if __name__ == "__main__":
    B, S = 2, 4  # small YOLO grid: 2 * 4 * 4 = 32 cells
    k0, k1 = jax.random.split(jax.random.PRNGKey(0))
    # positive box params so sqrt() stays real (as it would with sigmoid-ed predictions)
    pred = jax.random.uniform(k0, (B, S, S, C), jnp.float32, minval=0.05, maxval=0.95)
    target = jax.random.uniform(k1, (B, S, S, C), jnp.float32, minval=0.05, maxval=0.95)
    # object / no-object checkerboard on the target confidence channel (col 4)
    ii = jnp.arange(S)[:, None]
    jj = jnp.arange(S)[None, :]
    has_obj = ((ii + jj) % 2 == 0)[None, :, :]              # (1, S, S)
    target = target.at[..., 4].set(jnp.where(has_obj, target[..., 4], 0.0))

    loss = jax.jit(yolo_loss)(pred, target)
    loss = jax.block_until_ready(loss)

    ref = myloss_ref_numpy(np.asarray(pred), np.asarray(target))
    np.testing.assert_allclose(float(loss), float(ref), rtol=1e-4, atol=1e-4)

    print("KERNEL_OK")
</pallas_src>

<mosaic_0001>
module attributes {stable_mosaic.version = 11 : i64} {
  func.func @yolo_loss_kernel(%arg0: i32, %arg1: i32, %arg2: memref<30x128xf32, #tpu.memory_space<vmem>>, %arg3: memref<30x128xf32, #tpu.memory_space<vmem>>, %arg4: memref<8x128xf32, #tpu.memory_space<vmem>>, %arg5: memref<8x128xf32, #tpu.memory_space<vmem>>) attributes {dimension_semantics = [#tpu.dimension_semantics<arbitrary>, #tpu.dimension_semantics<arbitrary>], iteration_bounds = array<i64: 1, 1>, scalar_prefetch = 0 : i64, scratch_operands = 1 : i64, tpu.core_type = #tpu.core_type<tc>, window_params = [{transform_indices = @transform_0, window_bounds = array<i64: 30, 128>}, {transform_indices = @transform_1, window_bounds = array<i64: 30, 128>}, {transform_indices = @transform_2, window_bounds = array<i64: 8, 128>}]} {
    %c0_i32 = arith.constant 0 : i32
    %0 = arith.cmpi eq, %arg1, %c0_i32 : i32
    %1 = arith.extui %0 : i1 to i32
    %c0_i32_0 = arith.constant 0 : i32
    %2 = arith.cmpi ne, %1, %c0_i32_0 : i32
    scf.if %2 {
      %cst_29 = arith.constant 0.000000e+00 : f32
      %155 = vector.broadcast %cst_29 : f32 to vector<8x128xf32>
      %c0_30 = arith.constant 0 : index
      %c0_31 = arith.constant 0 : index
      %156 = vector.load %arg5[%c0_30, %c0_31] : memref<8x128xf32, #tpu.memory_space<vmem>>, vector<8x128xf32>
      tpu.vector_store %arg5[%c0_30, %c0_31], %155 {strides = array<i32>} : memref<8x128xf32, #tpu.memory_space<vmem>>, vector<8x128xf32>,
    } else {
    }
    %c0 = arith.constant 0 : index
    %c0_1 = arith.constant 0 : index
    %3 = vector.load %arg2[%c0, %c0_1] : memref<30x128xf32, #tpu.memory_space<vmem>>, vector<30x128xf32>
    %c0_2 = arith.constant 0 : index
    %c0_3 = arith.constant 0 : index
    %4 = vector.load %arg3[%c0_2, %c0_3] : memref<30x128xf32, #tpu.memory_space<vmem>>, vector<30x128xf32>
    %5 = vector.extract_strided_slice %4 {offsets = [4, 0], sizes = [1, 128], strides = [1, 1]} : vector<30x128xf32> to vector<1x128xf32>
    %cst = arith.constant 0.000000e+00 : f32
    %6 = vector.broadcast %cst : f32 to vector<1x128xf32>
    %7 = arith.cmpf ogt, %5, %6 : vector<1x128xf32>
    %cst_4 = arith.constant 0.000000e+00 : f32
    %8 = vector.broadcast %cst_4 : f32 to vector<1x128xf32>
    %9 = arith.cmpf oeq, %5, %8 : vector<1x128xf32>
    %10 = vector.extract_strided_slice %3 {offsets = [4, 0], sizes = [1, 128], strides = [1, 1]} : vector<30x128xf32> to vector<1x128xf32>
    %11 = vector.extract_strided_slice %4 {offsets = [4, 0], sizes = [1, 128], strides = [1, 1]} : vector<30x128xf32> to vector<1x128xf32>
    %12 = arith.subf %10, %11 : vector<1x128xf32>
    %13 = vector.extract_strided_slice %3 {offsets = [9, 0], sizes = [1, 128], strides = [1, 1]} : vector<30x128xf32> to vector<1x128xf32>
    %14 = vector.extract_strided_slice %4 {offsets = [9, 0], sizes = [1, 128], strides = [1, 1]} : vector<30x128xf32> to vector<1x128xf32>
    %15 = arith.subf %13, %14 : vector<1x128xf32>
    %16 = arith.mulf %12, %12 : vector<1x128xf32>
    %17 = arith.mulf %15, %15 : vector<1x128xf32>
    %18 = arith.addf %16, %17 : vector<1x128xf32>
    %cst_5 = arith.constant 0.000000e+00 : f32
    %19 = vector.broadcast %cst_5 : f32 to vector<1x128xf32>
    %20 = arith.select %9, %18, %19 : vector<1x128xi1>, vector<1x128xf32>
    %21 = vector.extract_strided_slice %3 {offsets = [10, 0], sizes = [20, 128], strides = [1, 1]} : vector<30x128xf32> to vector<20x128xf32>
    %22 = vector.extract_strided_slice %4 {offsets = [10, 0], sizes = [20, 128], strides = [1, 1]} : vector<30x128xf32> to vector<20x128xf32>
    %23 = arith.subf %21, %22 : vector<20x128xf32>
    %24 = arith.mulf %23, %23 : vector<20x128xf32>
    %cst_6 = arith.constant 0.000000e+00 : f32
    %25 = vector.shape_cast %7 : vector<1x128xi1> to vector<1x128xi1>
    %26 = vector.broadcast %25 : vector<1x128xi1> to vector<20x128xi1>
    %27 = vector.broadcast %cst_6 : f32 to vector<20x128xf32>
    %28 = arith.select %26, %24, %27 : vector<20x128xi1>, vector<20x128xf32>
    %29 = vector.extract_strided_slice %4 {offsets = [0, 0], sizes = [2, 128], strides = [1, 1]} : vector<30x128xf32> to vector<2x128xf32>
    %30 = vector.extract_strided_slice %4 {offsets = [2, 0], sizes = [2, 128], strides = [1, 1]} : vector<30x128xf32> to vector<2x128xf32>
    %cst_7 = arith.constant 5.000000e-01 : f32
    %31 = vector.broadcast %cst_7 : f32 to vector<2x128xf32>
    %32 = arith.mulf %31, %30 : vector<2x128xf32>
    %33 = arith.subf %29, %32 : vector<2x128xf32>
    %34 = vector.extract_strided_slice %4 {offsets = [0, 0], sizes = [2, 128], strides = [1, 1]} : vector<30x128xf32> to vector<2x128xf32>
    %35 = vector.extract_strided_slice %4 {offsets = [2, 0], sizes = [2, 128], strides = [1, 1]} : vector<30x128xf32> to vector<2x128xf32>
    %cst_8 = arith.constant 5.000000e-01 : f32
    %36 = vector.broadcast %cst_8 : f32 to vector<2x128xf32>
    %37 = arith.mulf %36, %35 : vector<2x128xf32>
    %38 = arith.addf %34, %37 : vector<2x128xf32>
    %39 = arith.subf %38, %33 : vector<2x128xf32>
    %40 = vector.extract_strided_slice %39 {offsets = [0, 0], sizes = [1, 128], strides = [1, 1]} : vector<2x128xf32> to vector<1x128xf32>
    %41 = vector.extract_strided_slice %39 {offsets = [1, 0], sizes = [1, 128], strides = [1, 1]} : vector<2x128xf32> to vector<1x128xf32>
    %42 = arith.mulf %40, %41 : vector<1x128xf32>
    %43 = vector.extract_strided_slice %3 {offsets = [5, 0], sizes = [4, 128], strides = [1, 1]} : vector<30x128xf32> to vector<4x128xf32>
    %44 = vector.extract_strided_slice %43 {offsets = [0, 0], sizes = [2, 128], strides = [1, 1]} : vector<4x128xf32> to vector<2x128xf32>
    %45 = vector.extract_strided_slice %43 {offsets = [2, 0], sizes = [2, 128], strides = [1, 1]} : vector<4x128xf32> to vector<2x128xf32>
    %cst_9 = arith.constant 5.000000e-01 : f32
    %46 = vector.broadcast %cst_9 : f32 to vector<2x128xf32>
    %47 = arith.mulf %46, %45 : vector<2x128xf32>
    %48 = arith.subf %44, %47 : vector<2x128xf32>
    %49 = vector.extract_strided_slice %43 {offsets = [0, 0], sizes = [2, 128], strides = [1, 1]} : vector<4x128xf32> to vector<2x128xf32>
    %50 = vector.extract_strided_slice %43 {offsets = [2, 0], sizes = [2, 128], strides = [1, 1]} : vector<4x128xf32> to vector<2x128xf32>
    %cst_10 = arith.constant 5.000000e-01 : f32
    %51 = vector.broadcast %cst_10 : f32 to vector<2x128xf32>
    %52 = arith.mulf %51, %50 : vector<2x128xf32>
    %53 = arith.addf %49, %52 : vector<2x128xf32>
    %54 = arith.maximumf %48, %33 : vector<2x128xf32>
    %55 = arith.minimumf %53, %38 : vector<2x128xf32>
    %56 = arith.subf %55, %54 : vector<2x128xf32>
    %cst_11 = arith.constant 0.000000e+00 : f32
    %57 = vector.broadcast %cst_11 : f32 to vector<2x128xf32>
    %58 = arith.cmpf olt, %56, %57 : vector<2x128xf32>
    %59 = arith.extui %58 : vector<2x128xi1> to vector<2x128xi32>
    %60 = arith.sitofp %59 : vector<2x128xi32> to vector<2x128xf32>
    %61 = vector.extract_strided_slice %60 {offsets = [0, 0], sizes = [1, 128], strides = [1, 1]} : vector<2x128xf32> to vector<1x128xf32>
    %62 = vector.extract_strided_slice %60 {offsets = [1, 0], sizes = [1, 128], strides = [1, 1]} : vector<2x128xf32> to vector<1x128xf32>
    %63 = arith.mulf %61, %62 : vector<1x128xf32>
    %64 = arith.subf %53, %48 : vector<2x128xf32>
    %65 = vector.extract_strided_slice %64 {offsets = [0, 0], sizes = [1, 128], strides = [1, 1]} : vector<2x128xf32> to vector<1x128xf32>
    %66 = vector.extract_strided_slice %64 {offsets = [1, 0], sizes = [1, 128], strides = [1, 1]} : vector<2x128xf32> to vector<1x128xf32>
    %67 = arith.mulf %65, %66 : vector<1x128xf32>
    %68 = arith.addf %67, %42 : vector<1x128xf32>
    %69 = arith.subf %68, %63 : vector<1x128xf32>
    %70 = arith.divf %63, %69 : vector<1x128xf32>
    %71 = vector.extract_strided_slice %3 {offsets = [0, 0], sizes = [4, 128], strides = [1, 1]} : vector<30x128xf32> to vector<4x128xf32>
    %72 = vector.extract_strided_slice %71 {offsets = [0, 0], sizes = [2, 128], strides = [1, 1]} : vector<4x128xf32> to vector<2x128xf32>
    %73 = vector.extract_strided_slice %71 {offsets = [2, 0], sizes = [2, 128], strides = [1, 1]} : vector<4x128xf32> to vector<2x128xf32>
    %cst_12 = arith.constant 5.000000e-01 : f32
    %74 = vector.broadcast %cst_12 : f32 to vector<2x128xf32>
    %75 = arith.mulf %74, %73 : vector<2x128xf32>
    %76 = arith.subf %72, %75 : vector<2x128xf32>
    %77 = vector.extract_strided_slice %71 {offsets = [0, 0], sizes = [2, 128], strides = [1, 1]} : vector<4x128xf32> to vector<2x128xf32>
    %78 = vector.extract_strided_slice %71 {offsets = [2, 0], sizes = [2, 128], strides = [1, 1]} : vector<4x128xf32> to vector<2x128xf32>
    %cst_13 = arith.constant 5.000000e-01 : f32
    %79 = vector.broadcast %cst_13 : f32 to vector<2x128xf32>
    %80 = arith.mulf %79, %78 : vector<2x128xf32>
    %81 = arith.addf %77, %80 : vector<2x128xf32>
    %82 = arith.maximumf %76, %33 : vector<2x128xf32>
    %83 = arith.minimumf %81, %38 : vector<2x128xf32>
    %84 = arith.subf %83, %82 : vector<2x128xf32>
    %cst_14 = arith.constant 0.000000e+00 : f32
    %85 = vector.broadcast %cst_14 : f32 to vector<2x128xf32>
    %86 = arith.cmpf olt, %84, %85 : vector<2x128xf32>
    %87 = arith.extui %86 : vector<2x128xi1> to vector<2x128xi32>
    %88 = arith.sitofp %87 : vector<2x128xi32> to vector<2x128xf32>
    %89 = vector.extract_strided_slice %88 {offsets = [0, 0], sizes = [1, 128], strides = [1, 1]} : vector<2x128xf32> to vector<1x128xf32>
    %90 = vector.extract_strided_slice %88 {offsets = [1, 0], sizes = [1, 128], strides = [1, 1]} : vector<2x128xf32> to vector<1x128xf32>
    %91 = arith.mulf %89, %90 : vector<1x128xf32>
    %92 = arith.subf %81, %76 : vector<2x128xf32>
    %93 = vector.extract_strided_slice %92 {offsets = [0, 0], sizes = [1, 128], strides = [1, 1]} : vector<2x128xf32> to vector<1x128xf32>
    %94 = vector.extract_strided_slice %92 {offsets = [1, 0], sizes = [1, 128], strides = [1, 1]} : vector<2x128xf32> to vector<1x128xf32>
    %95 = arith.mulf %93, %94 : vector<1x128xf32>
    %96 = arith.addf %95, %42 : vector<1x128xf32>
    %97 = arith.subf %96, %91 : vector<1x128xf32>
    %98 = arith.divf %91, %97 : vector<1x128xf32>
    %99 = arith.cmpf ogt, %70, %98 : vector<1x128xf32>
    %100 = vector.extract_strided_slice %3 {offsets = [5, 0], sizes = [5, 128], strides = [1, 1]} : vector<30x128xf32> to vector<5x128xf32>
    %101 = vector.extract_strided_slice %3 {offsets = [0, 0], sizes = [5, 128], strides = [1, 1]} : vector<30x128xf32> to vector<5x128xf32>
    %102 = vector.shape_cast %99 : vector<1x128xi1> to vector<1x128xi1>
    %103 = vector.broadcast %102 : vector<1x128xi1> to vector<5x128xi1>
    %104 = arith.select %103, %100, %101 : vector<5x128xi1>, vector<5x128xf32>
    %105 = vector.extract_strided_slice %4 {offsets = [5, 0], sizes = [5, 128], strides = [1, 1]} : vector<30x128xf32> to vector<5x128xf32>
    %106 = vector.extract_strided_slice %4 {offsets = [0, 0], sizes = [5, 128], strides = [1, 1]} : vector<30x128xf32> to vector<5x128xf32>
    %107 = vector.shape_cast %99 : vector<1x128xi1> to vector<1x128xi1>
    %108 = vector.broadcast %107 : vector<1x128xi1> to vector<5x128xi1>
    %109 = arith.select %108, %105, %106 : vector<5x128xi1>, vector<5x128xf32>
    %110 = vector.extract_strided_slice %104 {offsets = [0, 0], sizes = [2, 128], strides = [1, 1]} : vector<5x128xf32> to vector<2x128xf32>
    %111 = vector.extract_strided_slice %109 {offsets = [0, 0], sizes = [2, 128], strides = [1, 1]} : vector<5x128xf32> to vector<2x128xf32>
    %112 = arith.subf %110, %111 : vector<2x128xf32>
    %113 = vector.extract_strided_slice %104 {offsets = [2, 0], sizes = [2, 128], strides = [1, 1]} : vector<5x128xf32> to vector<2x128xf32>
    %114 = math.sqrt %113 : vector<2x128xf32>
    %115 = vector.extract_strided_slice %109 {offsets = [2, 0], sizes = [2, 128], strides = [1, 1]} : vector<5x128xf32> to vector<2x128xf32>
    %116 = math.sqrt %115 : vector<2x128xf32>
    %117 = arith.subf %114, %116 : vector<2x128xf32>
    %118 = vector.extract_strided_slice %104 {offsets = [4, 0], sizes = [1, 128], strides = [1, 1]} : vector<5x128xf32> to vector<1x128xf32>
    %119 = vector.extract_strided_slice %109 {offsets = [4, 0], sizes = [1, 128], strides = [1, 1]} : vector<5x128xf32> to vector<1x128xf32>
    %120 = arith.subf %118, %119 : vector<1x128xf32>
    %121 = arith.mulf %112, %112 : vector<2x128xf32>
    %cst_15 = arith.constant 0.000000e+00 : f32
    %122 = vector.shape_cast %7 : vector<1x128xi1> to vector<1x128xi1>
    %123 = vector.broadcast %122 : vector<1x128xi1> to vector<2x128xi1>
    %124 = vector.broadcast %cst_15 : f32 to vector<2x128xf32>
    %125 = arith.select %123, %121, %124 : vector<2x128xi1>, vector<2x128xf32>
    %126 = arith.mulf %117, %117 : vector<2x128xf32>
    %cst_16 = arith.constant 0.000000e+00 : f32
    %127 = vector.shape_cast %7 : vector<1x128xi1> to vector<1x128xi1>
    %128 = vector.broadcast %127 : vector<1x128xi1> to vector<2x128xi1>
    %129 = vector.broadcast %cst_16 : f32 to vector<2x128xf32>
    %130 = arith.select %128, %126, %129 : vector<2x128xi1>, vector<2x128xf32>
    %131 = arith.mulf %120, %120 : vector<1x128xf32>
    %cst_17 = arith.constant 2.000000e+00 : f32
    %132 = vector.broadcast %cst_17 : f32 to vector<1x128xf32>
    %133 = arith.mulf %132, %131 : vector<1x128xf32>
    %cst_18 = arith.constant 0.000000e+00 : f32
    %134 = vector.broadcast %cst_18 : f32 to vector<1x128xf32>
    %135 = arith.select %7, %133, %134 : vector<1x128xi1>, vector<1x128xf32>
    %cst_19 = arith.constant dense<0.000000e+00> : vector<128xf32>
    %136 = vector.multi_reduction <add>, %28, %cst_19 [0] : vector<20x128xf32> to vector<128xf32>
    %137 = vector.shape_cast %136 : vector<128xf32> to vector<1x128xf32>
    %138 = arith.addf %20, %137 : vector<1x128xf32>
    %cst_20 = arith.constant dense<0.000000e+00> : vector<128xf32>
    %139 = vector.multi_reduction <add>, %125, %cst_20 [0] : vector<2x128xf32> to vector<128xf32>
    %140 = vector.shape_cast %139 : vector<128xf32> to vector<1x128xf32>
    %141 = arith.addf %138, %140 : vector<1x128xf32>
    %cst_21 = arith.constant dense<0.000000e+00> : vector<128xf32>
    %142 = vector.multi_reduction <add>, %130, %cst_21 [0] : vector<2x128xf32> to vector<128xf32>
    %143 = vector.shape_cast %142 : vector<128xf32> to vector<1x128xf32>
    %144 = arith.addf %141, %143 : vector<1x128xf32>
    %145 = arith.addf %144, %135 : vector<1x128xf32>
    %cst_22 = arith.constant dense<0.000000e+00> : vector<1xf32>
    %146 = vector.multi_reduction <add>, %145, %cst_22 [1] : vector<1x128xf32> to vector<1xf32>
    %147 = vector.shape_cast %146 : vector<1xf32> to vector<1x1xf32>
    %c0_23 = arith.constant 0 : index
    %c0_24 = arith.constant 0 : index
    %148 = vector.load %arg5[%c0_23, %c0_24] : memref<8x128xf32, #tpu.memory_space<vmem>>, vector<8x128xf32>
    %149 = vector.broadcast %147 : vector<1x1xf32> to vector<8x128xf32>
    %150 = arith.addf %148, %149 : vector<8x128xf32>
    %c0_25 = arith.constant 0 : index
    %c0_26 = arith.constant 0 : index
    %151 = vector.load %arg5[%c0_25, %c0_26] : memref<8x128xf32, #tpu.memory_space<vmem>>, vector<8x128xf32>
    tpu.vector_store %arg5[%c0_25, %c0_26], %150 {strides = array<i32>} : memref<8x128xf32, #tpu.memory_space<vmem>>, vector<8x128xf32>,
    %c0_i32_27 = arith.constant 0 : i32
    %152 = arith.cmpi eq, %arg1, %c0_i32_27 : i32
    %153 = arith.extui %152 : i1 to i32
    %c0_i32_28 = arith.constant 0 : i32
    %154 = arith.cmpi ne, %153, %c0_i32_28 : i32
    scf.if %154 {
      %c0_29 = arith.constant 0 : index
      %c0_30 = arith.constant 0 : index
      %155 = vector.load %arg5[%c0_29, %c0_30] : memref<8x128xf32, #tpu.memory_space<vmem>>, vector<8x128xf32>
      %c0_31 = arith.constant 0 : index
      %c0_32 = arith.constant 0 : index
      %156 = vector.load %arg4[%c0_31, %c0_32] : memref<8x128xf32, #tpu.memory_space<vmem>>, vector<8x128xf32>
      tpu.vector_store %arg4[%c0_31, %c0_32], %155 {strides = array<i32>} : memref<8x128xf32, #tpu.memory_space<vmem>>, vector<8x128xf32>,
    } else {
    }
    return
  }
  func.func @transform_0(%arg0: i32, %arg1: i32) -> (i32, i32) {
    %c1_i32 = arith.constant 1 : i32
    %0 = arith.muli %arg0, %c1_i32 : i32
    %1 = arith.addi %0, %arg1 : i32
    %c0_i32 = arith.constant 0 : i32
    %c0_i32_0 = arith.constant 0 : i32
    return %c0_i32, %1 : i32, i32
  }
  func.func @transform_1(%arg0: i32, %arg1: i32) -> (i32, i32) {
    %c1_i32 = arith.constant 1 : i32
    %0 = arith.muli %arg0, %c1_i32 : i32
    %1 = arith.addi %0, %arg1 : i32
    %c0_i32 = arith.constant 0 : i32
    %c0_i32_0 = arith.constant 0 : i32
    return %c0_i32, %1 : i32, i32
  }
  func.func @transform_2(%arg0: i32, %arg1: i32) -> (i32, i32) {
    %c0_i32 = arith.constant 0 : i32
    %c0_i32_0 = arith.constant 0 : i32
    return %arg0, %c0_i32 : i32, i32
  }
}

</mosaic_0001>

<bundles_post_ra>
// kernel: yolo_loss.1
= control target key start
LH: loop header
LB: loop body
LE: loop exit
PB: predicated region body
PF: predicated region fallthrough
CT: control target
= control target key end

     0   :  { %vm97_vm0 = vcmask 1045504   ;;  %v316_v42 = vmov 0.0   ;;  %v74_v50 = vlaneseq  ;;  %v317_v60 = vmov 0   ;;  %s431_s0 = inlined_call_operand.vmem [shape: f32[30,128], index: 0, kind: input, shape index: {}]   ;;  %s432_s1 = inlined_call_operand.vmem [shape: f32[30,128], index: 1, kind: input, shape index: {}]   ;;  %s433_s2 = inlined_call_operand.vmem [shape: f32[8,128], index: 2, kind: output, shape index: {}]  }
   0x1   :  { %v336_v0 = vld [vmem:[%s431_s0] sm:$0xff]  ;;  %v341_v1 = vld [vmem:[%s431_s0 + $0x8] sm:$0xff]  ;;  %v52_v55 = vld [vmem:[%s431_s0 + $0x10] sm:$0xff]  ;;  %vm230_vm8 = vcmask 1043456   ;;  %vm243_vm9 = vcmask 1041408  }
   0x2   :  { %v346_v2 = vld [vmem:[%s432_s1] sm:$0xff]  ;;  %v351_v3 = vld [vmem:[%s432_s1 + $0x8] sm:$0xff]  ;;  %v93_v4 = vmul.f32 0.5, %v336_v0  ;;  %v94_v10 = vmul.f32 0.5, %v341_v1  ;;  %v374_v54 = vshrl.u32 %v74_v50, 7  ;;  %v56_v57 = vld [vmem:[%s432_s1 + $0x10] sm:$0xff] }
   0x3   :  { %v60_v5 = vsub.f32 %v336_v0, %v346_v2  ;;  %v61_v6 = vsub.f32 %v341_v1, %v351_v3  ;;  %v82_v9 = vmul.f32 0.5, %v346_v2  ;;  %vm59_vm1 = vcmp.eq.f32.partialorder %v346_v2, 0.0  ;;  %v53_v56 = vld [vmem:[%s431_s0 + $0x18] sm:$0x3f] }
   0x4   :  { %v98_v11 = vrot.slane %v93_v4, 2  ;;  %v99_v14 = vrot.slane %v94_v10, 2  ;;  %vm58_vm4 = vcmp.gt.f32.partialorder %v346_v2, 0.0  ;;  %v57_v58 = vld [vmem:[%s432_s1 + $0x18] sm:$0x3f]  ;;  %v76_v59 = vsub.s32 4, %v374_v54 }
   0x5   :  { %v62_v7 = vmul.f32 %v60_v5, %v60_v5  ;;  %v358_v8 = vmul.f32 %v61_v6, %v61_v6  ;;  %v84_v13 = vrot.slane %v82_v9, 2  ;;  %v73_v61 = vsel %vm58_vm4, 1, %v317_v60 }
   0x6   :  { %v133_v15 = vsub.f32 %v336_v0, %v98_v11  ;;  %v134_v16 = vadd.f32 %v98_v11, %v336_v0  ;;  %v100_v20 = vsel %vm97_vm0, %v98_v11, %v99_v14  ;;  %v69_v62 = vsub.f32 %v52_v55, %v56_v57 }
   0x7   :  { %v65_v12 = vrot.slane %v358_v8, 5  ;;  %v86_v18 = vsub.f32 %v346_v2, %v84_v13  ;;  %v87_v19 = vadd.f32 %v84_v13, %v346_v2  ;;  %v102_v23 = vsub.f32 %v336_v0, %v100_v20 }
   0x8   :  { %v145_v21 = vsub.f32 %v134_v16, %v133_v15  ;;  %v103_v24 = vadd.f32 %v100_v20, %v336_v0  ;;  %v70_v63 = vsub.f32 %v53_v56, %v57_v58  ;;  %v393_v4 = vrot.slane %v73_v61, %v76_v59 }
   0x9   :  { %v67_v17 = vadd.f32 %v65_v12, %v62_v7  ;;  %v88_v25 = vsub.f32 %v87_v19, %v86_v18  ;;  %v105_v26 = vrot.slane %v86_v18, 3  ;;  %v109_v27 = vrot.slane %v87_v19, 3 }
   0xa   :  { %v135_v28 = vmax.f32 %v133_v15, %v86_v18  ;;  %v120_v29 = vsub.f32 %v103_v24, %v102_v23  ;;  %v136_v30 = vmin.f32 %v134_v16, %v87_v19  ;;  %v147_v31 = vrot.slane %v145_v21, 1 }
   0xb   :  { %v369_v22 = vsel %vm59_vm1, %v67_v17, 0.0  ;;  %v90_v32 = vrot.slane %v88_v25, 1  ;;  %v107_v33 = vmax.f32 %v102_v23, %v105_v26  ;;  %v111_v34 = vmin.f32 %v103_v24, %v109_v27 }
   0xc   :  { %v122_v35 = vrot.slane %v120_v29, 1  ;;  %v137_v36 = vsub.f32 %v136_v30, %v135_v28  ;;  %v149_v37 = vmul.f32 %v147_v31, %v145_v21  ;;  %v71_v5 = vmul.f32 %v69_v62, %v69_v62 }
   0xd   :  { %v92_v38 = vmul.f32 %v90_v32, %v88_v25  ;;  %v112_v39 = vsub.f32 %v111_v34, %v107_v33  ;;  %v72_v6 = vmul.f32 %v70_v63, %v70_v63  ;;  %vm78_vm5 = vcmp.eq.s32.totalorder %v393_v4, 1 }
   0xe   :  { %v124_v40 = vmul.f32 %v122_v35, %v120_v29  ;;  %vm138_vm2 = vcmp.lt.f32.partialorder %v137_v36, 0.0  ;;  %v79_v10 = vsel %vm78_vm5, %v358_v8, 0.0  ;;  %v80_v11 = vsel %vm78_vm5, %v71_v5, 0.0 }
   0xf   :  { %vm113_vm3 = vcmp.lt.f32.partialorder %v112_v39, 0.0  ;;  %v126_v41 = vrot.slane %v92_v38, 3  ;;  %v301_v43 = vsel %vm138_vm2, 1.0, %v316_v42  ;;  %v150_v46 = vadd.f32 %v149_v37, %v92_v38 }
  0x10   :  { %v300_v44 = vsel %vm113_vm3, 1.0, %v316_v42  ;;  %v142_v45 = vrot.slane %v301_v43, 1  ;;  %v81_v12 = vsel %vm78_vm5, %v72_v6, 0.0  ;;  %v161_v16 = vsub.s32 5, %v374_v54 }
  0x11   :  { %v117_v47 = vrot.slane %v300_v44, 1  ;;  %v128_v48 = vadd.f32 %v126_v41, %v124_v40  ;;  %v221_v17 = vrot.slane %v79_v10, 2  ;;  %v222_v18 = vrot.slane %v80_v11, 2 }
  0x12   :  { %v144_v49 = vmul.f32 %v301_v43, %v142_v45  ;;  %v224_v19 = vrot.slane %v81_v12, 2  ;;  %v165_v21 = vrot.slane %v336_v0, 3  ;;  %v170_v8 = vrot.slane %v346_v2, 3 }
  0x13   :  { %v119_v51 = vmul.f32 %v300_v44, %v117_v47  ;;  %v223_v24 = vsel %vm97_vm0, %v221_v17, %v222_v18  ;;  %vm254_vm2 = vcmask 1040384   ;;  %vm268_vm3 = vcmask 1044484  }
  0x14   :  { %v151_v52 = vsub.f32 %v150_v46, %v144_v49  ;;  %v225_v25 = vsel %vm97_vm0, %v222_v18, %v224_v19  ;;  %v231_v32 = vsel %vm230_vm8, %v224_v19, 0.0 }
  0x15   :  { %v129_v53 = vsub.f32 %v128_v48, %v119_v51  ;;  %v229_v31 = vadd.f32 %v225_v25, %v223_v24 }
  0x16   :  { %304 = vrcp.f32 %v151_v52 }
  0x17   :  { %306 = vrcp.f32 %v129_v53  ;;  %v232_v34 = vadd.f32 %v231_v32, %v229_v31 }
  0x23   :  { %v305_v7 = vpop.eup %304 }
  0x24   :  { %v307_v9 = vpop.eup %306  ;;  %v153_v13 = vmul.f32 %v305_v7, %v144_v49 }
  0x25   :  { %v131_v14 = vmul.f32 %v307_v9, %v119_v51 }
  0x26   :  { %v155_v15 = vrot.slane %v153_v13, 3 }
  0x28   :  { %vm157_vm6 = vcmp.gt.f32.partialorder %v131_v14, %v155_v15 }
  0x29   :  { %v158_v20 = vsel %vm157_vm6, 1, %v317_v60 }
  0x2a   :  { %v162_v23 = vrot.slane %v158_v20, %v161_v16 }
  0x2c   :  { %vm163_vm7 = vcmp.eq.s32.totalorder %v162_v23, 1 }
  0x2d   :  { %v167_v26 = vsel %vm163_vm7, %v336_v0, %v165_v21  ;;  %v168_v27 = vsel %vm163_vm7, %v341_v1, %v165_v21  ;;  %v172_v28 = vsel %vm163_vm7, %v346_v2, %v170_v8  ;;  %v173_v29 = vsel %vm163_vm7, %v351_v3, %v170_v8 }
  0x2e   :  { %v174_v30 = vsub.f32 %v167_v26, %v172_v28  ;;  %308 = vrsqrt.f32 %v167_v26  ;;  %v233_v0 = vrot.slane %v232_v34, 4  ;;  %vm177_vm10 = vcmp.eq.f32.partialorder %v167_v26, inf }
  0x2f   :  { %310 = vrsqrt.f32 %v168_v27  ;;  %vm179_vm11 = vcmp.eq.f32.partialorder %v167_v26, 0.0  ;;  %v180_v3 = vand.u32 2147483648, %v167_v26  ;;  %vm184_vm12 = vcmp.eq.f32.partialorder %v168_v27, inf }
  0x30   :  { %312 = vrsqrt.f32 %v172_v28  ;;  %v206_v33 = vmul.f32 %v174_v30, %v174_v30  ;;  %v234_v37 = vadd.f32 %v233_v0, %v232_v34  ;;  %vm186_vm13 = vcmp.eq.f32.partialorder %v168_v27, 0.0 }
  0x31   :  { %314 = vrsqrt.f32 %v173_v29  ;;  %v187_v41 = vand.u32 2147483648, %v168_v27  ;;  %vm191_vm14 = vcmp.eq.f32.partialorder %v172_v28, inf  ;;  %vm193_vm15 = vcmp.eq.f32.partialorder %v172_v28, 0.0 }
  0x32   :  { %v207_v35 = vsel %vm78_vm5, %v206_v33, 0.0  ;;  %v194_v45 = vand.u32 2147483648, %v172_v28  ;;  %vm198_vm0 = vcmp.eq.f32.partialorder %v173_v29, inf  ;;  %v201_v49 = vand.u32 2147483648, %v173_v29 }
  0x33   :  { %v241_v36 = vrot.slane %v207_v35, 5  ;;  %vm200_vm1 = vcmp.eq.f32.partialorder %v173_v29, 0.0  ;;  %v235_v56 = vrot.slane %v234_v37, 2  ;;  %v205_v11 = vsub.f32 %v168_v27, %v173_v29 }
  0x35   :  { %v244_v1 = vsel %vm243_vm9, %v241_v36, 0.0  ;;  %v236_v6 = vadd.f32 %v235_v56, %v234_v37  ;;  %v212_v18 = vmul.f32 %v205_v11, %v205_v11 }
  0x36   :  { %v245_v42 = vrot.slane %v244_v1, 4 }
  0x37   :  { %v237_v14 = vrot.slane %v236_v6, 1  ;;  %v213_v24 = vmul.f32 2.0, %v212_v18 }
  0x38   :  { %v246_v57 = vadd.f32 %v245_v42, %v244_v1 }
  0x39   :  { %v238_v20 = vadd.f32 %v237_v14, %v236_v6 }
  0x3a   :  { %v247_v7 = vrot.slane %v246_v57, 2 }
  0x3b   :  { %v309_v38 = vpop.eup %308  ;;  %v239_v25 = vadd.f32 %v238_v20, %v369_v22 }
  0x3c   :  { %v311_v39 = vpop.eup %310  ;;  %v176_v40 = vmul.f32 %v309_v38, %v167_v26  ;;  %v248_v15 = vadd.f32 %v247_v7, %v246_v57 }
  0x3d   :  { %v313_v43 = vpop.eup %312  ;;  %v183_v44 = vmul.f32 %v311_v39, %v168_v27 }
  0x3e   :  { %v315_v46 = vpop.eup %314  ;;  %v178_v47 = vsel %vm177_vm10, %v167_v26, %v176_v40  ;;  %v190_v48 = vmul.f32 %v313_v43, %v172_v28  ;;  %v249_v21 = vrot.slane %v248_v15, 1 }
  0x3f   :  { %v181_v50 = vsel %vm179_vm11, %v180_v3, %v178_v47  ;;  %v185_v51 = vsel %vm184_vm12, %v168_v27, %v183_v44  ;;  %v197_v52 = vmul.f32 %v315_v46, %v173_v29 }
  0x40   :  { %v188_v53 = vsel %vm186_vm13, %v187_v41, %v185_v51  ;;  %v192_v55 = vsel %vm191_vm14, %v172_v28, %v190_v48  ;;  %v250_v26 = vadd.f32 %v249_v21, %v248_v15  ;;  %v215_v28 = vrot.slane %v213_v24, 5 }
  0x41   :  { %v195_v58 = vsel %vm193_vm15, %v194_v45, %v192_v55  ;;  %v199_v60 = vsel %vm198_vm0, %v173_v29, %v197_v52 }
  0x42   :  { %v202_v61 = vsel %vm200_vm1, %v201_v49, %v199_v60  ;;  %v203_v62 = vsub.f32 %v181_v50, %v195_v58  ;;  %v251_v29 = vadd.f32 %v250_v26, %v239_v25  ;;  %v217_v32 = vsel %vm58_vm4, %v215_v28, 0.0 }
  0x43   :  { %v204_v63 = vsub.f32 %v188_v53, %v202_v61 }
  0x44   :  { %v208_v5 = vmul.f32 %v203_v62, %v203_v62 }
  0x45   :  { %v209_v9 = vmul.f32 %v204_v63, %v204_v63 }
  0x46   :  { %v210_v10 = vsel %vm78_vm5, %v208_v5, 0.0 }
  0x47   :  { %v211_v12 = vsel %vm78_vm5, %v209_v9, 0.0  ;;  %v255_v13 = vrot.slane %v210_v10, 7 }
  0x48   :  { %v256_v16 = vrot.slane %v211_v12, 7 }
  0x4a   :  { %v257_v17 = vsel %vm254_vm2, %v255_v13, %v256_v16 }
  0x4b   :  { %v259_v19 = vsel %vm243_vm9, %v257_v17, 0.0 }
  0x4c   :  { %v260_v8 = vrot.slane %v259_v19, 4 }
  0x4e   :  { %v261_v23 = vadd.f32 %v260_v8, %v259_v19 }
  0x50   :  { %v262_v27 = vrot.slane %v261_v23, 2 }
  0x52   :  { %v263_v4 = vadd.f32 %v262_v27, %v261_v23 }
  0x54   :  { %v264_v30 = vrot.slane %v263_v4, 1 }
  0x56   :  { %v265_v31 = vadd.f32 %v264_v30, %v263_v4 }
  0x58   :  { %v266_v33 = vadd.f32 %v265_v31, %v251_v29 }
  0x5a   :  { %v267_v34 = vadd.f32 %v266_v33, %v217_v32 }
  0x5c   :  { %v269_v35 = vsel %vm268_vm3, %v267_v34, 0.0 }
  0x5d   :  { %270 = vadd.xlane.f32.xlu0 %v269_v35 }
  0xe6   :  { %v271_v36 = vpop.xlane.xlu0 %270 }
  0xe7   :  { %v276_v0 = vrot.slane %v271_v36, %v76_v59 }
  0xe9   :  { %283 = vst [vmem:[%s433_s2] sm:$0xff] %v276_v0 }

</bundles_post_ra>
